<compile_context>
chip_gen: v5e
topology: v5e:2x2
jax: 0.10.0
libtpu: 0.0.40
codegen_flags: <defaults>
</compile_context>

<pallas_src>
import functools

import jax
import jax.numpy as jnp
from jax import lax
from jax.experimental import pallas as pl
from jax.experimental.pallas import tpu as pltpu


def _round_up(x, m):
    return ((x + m - 1) // m) * m


def _patch_embed_kernel(x_ref, w_ref, b_ref, o_ref):
    # x_ref: (bm, K)   packed patch rows
    # w_ref: (K, Ep)   packed (block-diagonal) weight, resident across tiles
    # b_ref: (1, Ep)   packed bias (f32)
    # o_ref: (bm, Ep)  lane-dense output block
    acc = jnp.dot(x_ref[...], w_ref[...], preferred_element_type=jnp.float32)
    o_ref[...] = (acc + b_ref[...]).astype(o_ref.dtype)


@functools.partial(jax.jit,
                   static_argnames=("patch_size", "compute_dtype", "out_dtype"))
def patch_embedding_linear(x_nchw, weight_pe, bias_e, cls_token_e, *,
                           patch_size, compute_dtype=None,
                           out_dtype=jnp.float32):
    """Forward pass of PatchEmbedding_Linear.

    x_nchw:      (B, C, H, W), W % patch_size == 0
    weight_pe:   (P*C, E) == torch Linear weight transposed, rows ordered as
                 the torch Rearrange produces them (s2-major, c-minor)
    bias_e:      (E,)
    cls_token_e: (E,)  == cls_token.reshape(E)
    compute_dtype: optional MXU operand dtype.  jnp.bfloat16 is recommended on
                 v5e, v6e and v7x (all three MXUs take bf16 natively; the
                 accumulate + bias + cast epilogue stays f32).
    out_dtype:   dtype of the returned embedding (bf16 halves output traffic
                 if the consumer allows; default f32).
    returns      (B, H*(W//patch_size) + 1, E) in out_dtype
    """
    B, C, H, W = x_nchw.shape
    assert W % patch_size == 0
    Wp = W // patch_size
    N = H * Wp
    P = patch_size * C
    E = weight_pe.shape[1]
    M = B * N

    # Cast activations to the compute dtype FIRST, so the layout pass below
    # and the kernel's input DMA both move narrow data.
    if compute_dtype is not None:
        x_nchw = x_nchw.astype(compute_dtype)

    # ---- activations: cheap layout (c-major, s2-minor feature order). ------
    # (B, C, H, Wp, s2) -> (B, H, Wp, C, s2): contiguous s2 chunks of the NCHW
    # input move as chunks; no element-granular gather over C.  Fused with the
    # pallas_call under this jit.
    patches = x_nchw.reshape(B, C, H, Wp, patch_size)
    patches = jnp.transpose(patches, (0, 2, 3, 1, 4))        # (B, H, Wp, C, s2)
    patches = patches.reshape(M, P)                           # feat = c*s2 + s2i

    # ---- weight: fold the torch (s2-major, c-minor) Rearrange ordering into
    # a one-time row permutation (hoist to init time in production). ---------
    idx = jnp.arange(P)
    c_idx = idx // patch_size
    s2_idx = idx % patch_size
    perm = s2_idx * C + c_idx                 # cheap index -> torch row index
    w_cheap = weight_pe[perm]                                 # (P, E)

    # ---- lane-density: pad E columns up to a power-of-two divisor of 128,
    # then fuse `pack = 128 // Ec` patch rows per kernel row so K and Ep (and
    # every output store) are 128-lane dense.  Do NOT enlarge pack past this:
    # the kernel is mem-bound and extra pack only wastes MACs / weight bytes.
    if E < 128:
        Ec = min(128, max(8, pl.next_power_of_2(E)))
        pack = 128 // Ec
    else:
        Ec = E
        pack = 1
    if Ec != E:
        w_cheap = jnp.pad(w_cheap, ((0, 0), (0, Ec - E)))
        bias_c = jnp.pad(bias_e, (0, Ec - E))
    else:
        bias_c = bias_e
    K = pack * P
    Ep = pack * Ec

    # Block-diagonal weight: kron(I_pack, w_cheap) -> (pack*P, pack*Ec).
    w_bd = jnp.kron(jnp.eye(pack, dtype=w_cheap.dtype), w_cheap)
    bias_packed = jnp.tile(bias_c, pack).reshape(1, Ep).astype(jnp.float32)
    if compute_dtype is not None:
        w_bd = w_bd.astype(compute_dtype)

    # ---- tiny (< pack rows) pad so the packed row-major view is exact. -----
    mp = pl.cdiv(M, pack)                     # packed row count
    M_pad = mp * pack
    if M_pad != M:
        patches = jnp.pad(patches, ((0, M_pad - M), (0, 0)))
    patches_packed = patches.reshape(mp, K)   # free row-major view

    # ---- tile choice: big tiles (mem-bound), but >= 2 tiles when possible so
    # the "parallel" axis can shard across v7x's two TensorCores.  Ragged last
    # block is masked by Pallas; no padding of mp to a multiple of bm. --------
    sub = 16 if patches_packed.dtype == jnp.bfloat16 else 8
    if mp <= sub:
        bm = _round_up(mp, sub)               # single tiny tile
    else:
        bm = min(2048, _round_up(pl.cdiv(mp, 2), sub))
    num_tiles = pl.cdiv(mp, bm)

    in_bytes = jnp.dtype(patches_packed.dtype).itemsize
    w_bytes = jnp.dtype(w_bd.dtype).itemsize
    out_bytes = jnp.dtype(out_dtype).itemsize
    cost = pl.CostEstimate(
        flops=2 * mp * K * Ep,
        transcendentals=0,
        bytes_accessed=(mp * K * in_bytes + K * Ep * w_bytes
                        + Ep * 4 + mp * Ep * out_bytes),
    )

    out_packed = pl.pallas_call(
        _patch_embed_kernel,
        out_shape=jax.ShapeDtypeStruct((mp, Ep), out_dtype),
        grid_spec=pltpu.PrefetchScalarGridSpec(
            num_scalar_prefetch=0,
            grid=(num_tiles,),
            in_specs=[
                pl.BlockSpec((bm, K), lambda i: (i, 0)),
                pl.BlockSpec((K, Ep), lambda i: (0, 0)),   # resident, no re-DMA
                pl.BlockSpec((1, Ep), lambda i: (0, 0)),
            ],
            out_specs=pl.BlockSpec((bm, Ep), lambda i: (i, 0)),
        ),
        compiler_params=pltpu.CompilerParams(
            dimension_semantics=("parallel",),
            vmem_limit_bytes=32 * 1024 * 1024),   # tiles are small on all gens
        cost_estimate=cost,
    )(patches_packed, w_bd, bias_packed)

    # Packed output is a free row-major view of the (M_pad, Ec) projection;
    # slice off the row pad and the zero-padded embedding columns.
    proj = out_packed.reshape(M_pad, Ec)[:M, :E].reshape(B, N, E)

    # cls-token prepend without a full concatenate copy: write proj into a
    # broadcast-initialized (B, N+1, E) buffer under the same jit.
    cls_full = jnp.broadcast_to(
        cls_token_e.astype(out_dtype).reshape(1, 1, E), (B, N + 1, E))
    return lax.dynamic_update_slice(cls_full, proj, (0, 1, 0))


def _reference(x_nchw, weight_pe, bias_e, cls_token_e, patch_size):
    """Pure-JAX reference that mirrors the torch module literally."""
    B, C, H, W = x_nchw.shape
    Wp = W // patch_size
    # Rearrange 'b c (h s1) (w s2) -> b (h w) (s1 s2 c)', s1=1, s2=patch_size.
    patches = x_nchw.reshape(B, C, H, Wp, patch_size)
    patches = jnp.transpose(patches, (0, 2, 3, 4, 1)).reshape(B, H * Wp, -1)
    proj = patches @ weight_pe + bias_e
    cls = jnp.broadcast_to(cls_token_e.reshape(1, 1, -1),
                           (B, 1, cls_token_e.shape[0]))
    return jnp.concatenate([cls, proj], axis=1)


if __name__ == "__main__":
    # Small shapes consistent with the module:
    #   in_channels=4, patch_size=8, emb_size=32, "seq_length"=W=64, H=2
    B, C, H, W = 2, 4, 2, 64
    patch_size = 8
    emb_size = 32
    P = patch_size * C           # Linear in-features
    N = H * (W // patch_size)    # number of patches

    key = jax.random.PRNGKey(0)
    k_x, k_w, k_b, k_cls, k_pos = jax.random.split(key, 5)

    x = jax.random.normal(k_x, (B, C, H, W), dtype=jnp.float32)

    # nn.Linear(P, emb_size): torch weight (emb_size, P); we store (P, emb_size)
    # with rows in the torch Rearrange order (s2-major, c-minor).
    weight_pe = (jax.random.normal(k_w, (P, emb_size), dtype=jnp.float32)
                 * (1.0 / jnp.sqrt(P)))
    bias_e = jax.random.normal(k_b, (emb_size,), dtype=jnp.float32) * 0.01
    cls_token = jax.random.normal(k_cls, (emb_size,), dtype=jnp.float32)
    # positions parameter exists on the torch module but is unused in forward().
    positions = jax.random.normal(k_pos, (N + 1, emb_size), dtype=jnp.float32)
    del positions

    # f32 compute/output here so we can compare tightly against the f32
    # reference; pass compute_dtype=jnp.bfloat16 (and optionally
    # out_dtype=jnp.bfloat16) on v5e/v6e/v7x for production shapes.
    out = patch_embedding_linear(x, weight_pe, bias_e, cls_token,
                                 patch_size=patch_size)
    out = jax.block_until_ready(out)

    ref = _reference(x, weight_pe, bias_e, cls_token, patch_size)
    assert out.shape == (B, N + 1, emb_size), out.shape
    assert jnp.allclose(out, ref, atol=1e-5, rtol=1e-5), "mismatch vs reference"

    print("KERNEL_OK")
</pallas_src>

<mosaic_0001>
module attributes {stable_mosaic.version = 11 : i64} {
  func.func @_patch_embed_kernel(%arg0: i32, %arg1: memref<8x128xf32, #tpu.memory_space<vmem>>, %arg2: memref<128x128xf32, #tpu.memory_space<vmem>>, %arg3: memref<1x128xf32, #tpu.memory_space<vmem>>, %arg4: memref<8x128xf32, #tpu.memory_space<vmem>>) attributes {dimension_semantics = [#tpu.dimension_semantics<parallel>], iteration_bounds = array<i64: 1>, scalar_prefetch = 0 : i64, scratch_operands = 0 : i64, tpu.core_type = #tpu.core_type<tc>, window_params = [{transform_indices = @transform_0, window_bounds = array<i64: 8, 128>}, {pipeline_mode = #tpu.pipeline_mode<synchronous>, transform_indices = @transform_1, window_bounds = array<i64: 128, 128>}, {pipeline_mode = #tpu.pipeline_mode<synchronous>, transform_indices = @transform_2, window_bounds = array<i64: 1, 128>}, {transform_indices = @transform_3, window_bounds = array<i64: 8, 128>}]} {
    %c0 = arith.constant 0 : index
    %c0_0 = arith.constant 0 : index
    %0 = vector.load %arg1[%c0, %c0_0] : memref<8x128xf32, #tpu.memory_space<vmem>>, vector<8x128xf32>
    %c0_1 = arith.constant 0 : index
    %c0_2 = arith.constant 0 : index
    %1 = vector.load %arg2[%c0_1, %c0_2] : memref<128x128xf32, #tpu.memory_space<vmem>>, vector<128x128xf32>
    %cst = arith.constant dense<0.000000e+00> : vector<8x128xf32>
    %2 = tpu.matmul %0, %1, %cst {dimension_numbers = #tpu.dot_dimension_numbers<[1], [0], [0], [1], [0, 0, 1, 1], [], []>} : vector<8x128xf32>, vector<128x128xf32>, vector<8x128xf32> -> vector<8x128xf32>
    %c0_3 = arith.constant 0 : index
    %c0_4 = arith.constant 0 : index
    %3 = vector.load %arg3[%c0_3, %c0_4] : memref<1x128xf32, #tpu.memory_space<vmem>>, vector<1x128xf32>
    %4 = vector.broadcast %3 : vector<1x128xf32> to vector<8x128xf32>
    %5 = arith.addf %2, %4 : vector<8x128xf32>
    %c0_5 = arith.constant 0 : index
    %c0_6 = arith.constant 0 : index
    %6 = vector.load %arg4[%c0_5, %c0_6] : memref<8x128xf32, #tpu.memory_space<vmem>>, vector<8x128xf32>
    tpu.vector_store %arg4[%c0_5, %c0_6], %5 {strides = array<i32>} : memref<8x128xf32, #tpu.memory_space<vmem>>, vector<8x128xf32>,
    return
  }
  func.func @transform_0(%arg0: i32) -> (i32, i32) {
    %c0_i32 = arith.constant 0 : i32
    %c0_i32_0 = arith.constant 0 : i32
    return %arg0, %c0_i32 : i32, i32
  }
  func.func @transform_1(%arg0: i32) -> (i32, i32) {
    %c0_i32 = arith.constant 0 : i32
    %c0_i32_0 = arith.constant 0 : i32
    %c0_i32_1 = arith.constant 0 : i32
    return %c0_i32, %c0_i32_0 : i32, i32
  }
  func.func @transform_2(%arg0: i32) -> (i32, i32) {
    %c0_i32 = arith.constant 0 : i32
    %c0_i32_0 = arith.constant 0 : i32
    %c0_i32_1 = arith.constant 0 : i32
    return %c0_i32, %c0_i32_0 : i32, i32
  }
  func.func @transform_3(%arg0: i32) -> (i32, i32) {
    %c0_i32 = arith.constant 0 : i32
    %c0_i32_0 = arith.constant 0 : i32
    return %arg0, %c0_i32 : i32, i32
  }
}

</mosaic_0001>

<bundles_post_ra>
// kernel: tile.8
= control target key start
LH: loop header
LB: loop body
LE: loop exit
PB: predicated region body
PF: predicated region fallthrough
CT: control target
= control target key end

     0   :  { %s22_s0 = inlined_call_operand.vmem [shape: f32[32], index: 0, kind: input, shape index: {}]   ;;  %s23_s1 = inlined_call_operand.vmem [shape: f32[4,32], index: 1, kind: output, shape index: {}]  }
   0x1   :  { %v4_v0 = vld [vmem:[%s22_s0] ss:$0 sm:$0xff] }
   0x2   :  { %5 = vst [vmem:[%s23_s1] sm:$0xf] %v4_v0 }

// kernel: tile.9
= control target key start
LH: loop header
LB: loop body
LE: loop exit
PB: predicated region body
PF: predicated region fallthrough
CT: control target
= control target key end

     0   :  { %s37_s8 = smov 32   ;;  %s38_s9 = smov 64   ;;  %vm7_vm0 = vcmask 261120   ;;  %vm13_vm1 = vcmask 1048320   ;;  %vm19_vm2 = vcmask 785920   ;;  %vm25_vm3 = vcmask 523520   ;;  %s55_s0 = inlined_call_operand.vmem [shape: f32[4,32], index: 0, kind: input, shape index: {}]   ;;  %s56_s1 = inlined_call_operand.vmem [shape: f32[1,128], index: 1, kind: output, shape index: {}]  }
   0x1   :  { %v4_v0 = vld [vmem:[%s55_s0] sm:$0xf]  ;;  %s36_s0 = smov 96  }
   0x2   :  { %5 = vst [vmem:[#allocation1] sm:$0xf] %v4_v0 }
   0x9   :  { %v10_v1 = vld [vmem:[#allocation1 + $0x3] sm:$0x1]   ;;  %v22_v2 = vld [vmem:[#allocation1 + $0x1] sm:$0x1]   ;;  %v16_v3 = vld [vmem:[#allocation1 + $0x2] sm:$0x1]  }
   0xa   :  { %11 = vrot.lane.b32.xlu0 %v10_v1, %s36_s0  ;;  %23 = vrot.lane.b32.xlu1 %v22_v2, %s37_s8  ;;  %v6_v4 = vld [vmem:[#allocation1] sm:$0x1]  }
   0xb   :  { %8 = vst.msk [vmem:[#allocation0] sm:$0x1] %vm7_vm0, %v6_v4  }
  0x12   :  { %17 = vrot.lane.b32.xlu0 %v16_v3, %s38_s9 }
  0x7c   :  { %v12_v5 = vpop.permute.xlu0 %11   ;;  %v24_v6 = vpop.permute.xlu1 %23  }
  0x7d   :  { %14 = vst.msk [vmem:[#allocation0] sm:$0x1] %vm13_vm1, %v12_v5  }
  0x84   :  { %v18_v7 = vpop.permute.xlu0 %17  }
  0x85   :  { %20 = vst.msk [vmem:[#allocation0] sm:$0x1] %vm19_vm2, %v18_v7  }
  0x86   :  { %26 = vst.msk [vmem:[#allocation0] sm:$0x1] %vm25_vm3, %v24_v6  }
  0x8d   :  { %v29_v8 = vld [vmem:[#allocation0] sm:$0x1] }
  0x8e   :  { %32 = vst [vmem:[%s56_s1] sm:$0x1] %v29_v8 }

// kernel: patch_embedding_linear.1
= control target key start
LH: loop header
LB: loop body
LE: loop exit
PB: predicated region body
PF: predicated region fallthrough
CT: control target
= control target key end

     0   :  { %s138_s1 = inlined_call_operand.vmem [shape: f32[128,128], index: 1, kind: input, shape index: {}]   ;;  %s139_s2 = inlined_call_operand.vmem [shape: f32[1,128], index: 2, kind: input, shape index: {}]   ;;  %s140_s0 = inlined_call_operand.vmem [shape: f32[8,128], index: 0, kind: input, shape index: {}]   ;;  %s141_s3 = inlined_call_operand.vmem [shape: f32[8,128], index: 3, kind: output, shape index: {}]  }
   0x1   :  { %v30_v0 = vld [vmem:[%s138_s1 + $0x78] sm:$0xff]  ;;  %v29_v1 = vld [vmem:[%s138_s1 + $0x70] sm:$0xff]  ;;  %v28_v2 = vld [vmem:[%s138_s1 + $0x68] sm:$0xff] }
   0x2   :  { %35 = vmatpush.msra.mxu0 %v30_v0  ;;  %v27_v3 = vld [vmem:[%s138_s1 + $0x60] sm:$0xff]  ;;  %v26_v4 = vld [vmem:[%s138_s1 + $0x58] sm:$0xff]  ;;  %v25_v5 = vld [vmem:[%s138_s1 + $0x50] sm:$0xff] }
   0x3   :  { %v24_v6 = vld [vmem:[%s138_s1 + $0x48] sm:$0xff]  ;;  %v23_v7 = vld [vmem:[%s138_s1 + $0x40] sm:$0xff]  ;;  %v22_v8 = vld [vmem:[%s138_s1 + $0x38] sm:$0xff] }
   0x4   :  { %36 = vmatpush.msra.mxu0 %v29_v1  ;;  %v21_v9 = vld [vmem:[%s138_s1 + $0x30] sm:$0xff]  ;;  %v20_v10 = vld [vmem:[%s138_s1 + $0x28] sm:$0xff]  ;;  %v19_v11 = vld [vmem:[%s138_s1 + $0x20] sm:$0xff] }
   0x5   :  { %v18_v12 = vld [vmem:[%s138_s1 + $0x18] sm:$0xff]  ;;  %v17_v13 = vld [vmem:[%s138_s1 + $0x10] sm:$0xff]  ;;  %v16_v14 = vld [vmem:[%s138_s1 + $0x8] sm:$0xff] }
   0x6   :  { %37 = vmatpush.msra.mxu0 %v28_v2  ;;  %v15_v15 = vld [vmem:[%s138_s1] sm:$0xff] }
   0x7   :  { %v14_v16 = vld [vmem:[%s140_s0] sm:$0xff] }
   0x8   :  { %38 = vmatpush.msra.mxu0 %v27_v3  ;;  %v60_v17 = vld [vmem:[%s139_s2] ss:$0 sm:$0xff] }
   0xa   :  { %39 = vmatpush.msra.mxu0 %v26_v4 }
   0xc   :  { %40 = vmatpush.msra.mxu0 %v25_v5 }
   0xe   :  { %41 = vmatpush.msra.mxu0 %v24_v6 }
  0x10   :  { %42 = vmatpush.msra.mxu0 %v23_v7 }
  0x12   :  { %43 = vmatpush.msra.mxu0 %v22_v8 }
  0x14   :  { %44 = vmatpush.msra.mxu0 %v21_v9 }
  0x16   :  { %45 = vmatpush.msra.mxu0 %v20_v10 }
  0x18   :  { %46 = vmatpush.msra.mxu0 %v19_v11 }
  0x1a   :  { %47 = vmatpush.msra.mxu0 %v18_v12 }
  0x1c   :  { %48 = vmatpush.msra.mxu0 %v17_v13 }
  0x1e   :  { %49 = vmatpush.msra.mxu0 %v16_v14 }
  0x20   :  { %50 = vmatpush.msra.mxu0 %v15_v15 }
  0x21   :  { %51 = vmatmul.f32.vlgmr.msra.gmra.mxu0 %v14_v16 }
  0x9e   :  { %v52_v18 = vpop.f32.mrf.mxu0 }
  0x9f   :  { %v53_v19 = vadd.f32 %v60_v17, %v52_v18 }
  0xa1   :  { %55 = vst [vmem:[%s141_s3] sm:$0xff] %v53_v19 }

</bundles_post_ra>
